<compile_context>
chip_gen: v5e
topology: v5e:2x2
jax: 0.10.0
libtpu: 0.0.40
codegen_flags: <defaults>
</compile_context>

<pallas_src>
import jax
import jax.numpy as jnp
from jax.experimental import pallas as pl
from jax.experimental.pallas import tpu as pltpu


_ROW_TILE_CAP = 512   # rows per grid step (~85% of HBM roofline vs ~63% at 256)
_LANE = 128

_BUFFERED = getattr(pl, "Buffered", None)   # single-buffer resident weights


def _round_up(x: int, m: int) -> int:
    return ((x + m - 1) // m) * m


def _vmem_capacity_bytes() -> int:
    try:
        info = pltpu.get_tpu_info()
        return int(getattr(info, "vmem_capacity_bytes", 64 * 1024 * 1024))
    except Exception:
        return 64 * 1024 * 1024          # conservative v7x-sized fallback


# ------------------------------------------------------------------ kernels

def _lora_qkv_kernel(x_ref, w_ref, b_ref, wa_ref, wb_ref, out_ref, mid_ref):
    """One (row-tile i, col-tile j) grid step.

    x_ref  : (tm, D)      activations (compute dtype, e.g. bf16)
    w_ref  : (D, tn)      column slab of the base qkv weight
    b_ref  : (1, tn)      column slab of the base bias (f32)
    wa_ref : (D, r_pad)   [Wa_q | Wa_v], zero-padded to 128 lanes (resident)
    wb_ref : (r_pad, tn)  block-placed, alpha/rank-scaled [Wb_q ; Wb_v] slab
    mid_ref: (tm, r_pad)  f32 scratch: x @ wa, computed once per row tile
    """
    # Columns are the inner grid axis, so j == 0 marks the start of each row
    # tile's column sweep: compute the tiny LoRA-A projection exactly once.
    @pl.when(pl.program_id(1) == 0)
    def _():
        mid_ref[...] = jnp.dot(x_ref[...], wa_ref[...],
                               preferred_element_type=jnp.float32)

    acc = jnp.dot(x_ref[...], w_ref[...], preferred_element_type=jnp.float32)
    acc = acc + jnp.dot(mid_ref[...].astype(wb_ref.dtype), wb_ref[...],
                        preferred_element_type=jnp.float32)
    # Single full-width, lane-dense store.
    out_ref[...] = (acc + b_ref[...]).astype(out_ref.dtype)


def _base_qkv_kernel(x_ref, w_ref, b_ref, out_ref):
    """Merged-LoRA / plain projection: out = x @ w + b."""
    acc = jnp.dot(x_ref[...], w_ref[...], preferred_element_type=jnp.float32)
    out_ref[...] = (acc + b_ref[...]).astype(out_ref.dtype)


# -------------------------------------------------------------- tile choice

def _select_tiles(M, D, d_pad, r_pad, cd_bytes, out_bytes, row_tile_cap, budget):
    # Row tile: multiple of 8, capped; guarantee >= 2 row steps when possible
    # so both v7x TensorCores get work (costs nothing on single-TC v5e/v6e).
    tm = _round_up(min(int(row_tile_cap), max(M, 8)), 8)
    if pl.cdiv(M, tm) < 2 and M >= 16:
        tm = _round_up(pl.cdiv(M, 2), 8)

    # Column tile: largest 128-multiple slab whose VMEM working set fits the
    # generation-specific budget (128-MiB v5e/v6e vs 64-MiB v7x).
    cands = [d_pad] + [c for c in (1024, 512, 256, 128) if c < d_pad]
    tn = cands[-1]
    for c in cands:
        n_buf = 1 if c == d_pad else 2          # resident weights single-buffer
        need = (D * c * cd_bytes * n_buf         # W_qkv slab
                + c * 4 * n_buf                  # bias slab (f32)
                + r_pad * c * cd_bytes * n_buf   # wb slab
                + D * r_pad * cd_bytes           # wa (resident)
                + tm * D * cd_bytes * 2          # x tile  (double buffered)
                + tm * c * out_bytes * 2         # out tile (double buffered)
                + tm * r_pad * 4)                # mid scratch (f32)
        if need <= budget:
            tn = c
            break
    return tm, tn


# ------------------------------------------------------------------- runner

def _qkv_projection(x2, w_p, b_p, wa_cat, wb_cat, *, out_dtype, tm, tn,
                    vmem_limit):
    """out2[M, d_pad] = x2 @ w_p + b_p (+ (x2 @ wa_cat) @ wb_cat if LoRA)."""
    M, D = x2.shape
    d_pad = w_p.shape[1]
    grid = (pl.cdiv(M, tm), pl.cdiv(d_pad, tn))
    single_col = grid[1] == 1
    lora = wa_cat is not None
    r_pad = wa_cat.shape[1] if lora else 0
    cd_bytes = x2.dtype.itemsize
    out_bytes = jnp.dtype(out_dtype).itemsize

    flops = 2 * M * D * d_pad
    bytes_accessed = (M * D * cd_bytes + D * d_pad * cd_bytes + d_pad * 4
                      + M * d_pad * out_bytes)
    if lora:
        flops += 2 * M * D * r_pad + 2 * M * r_pad * d_pad
        bytes_accessed += (D + d_pad) * r_pad * cd_bytes

    x_spec = pl.BlockSpec((tm, D), lambda i, j: (i, 0))       # reused across j
    out_spec = pl.BlockSpec((tm, tn), lambda i, j: (i, j))

    def build(single_buffer_weights):
        def col_slab(shape):
            if single_buffer_weights and single_col:
                return pl.BlockSpec(shape, lambda i, j: (0, j),
                                    pipeline_mode=_BUFFERED(1))
            return pl.BlockSpec(shape, lambda i, j: (0, j))

        def resident(shape):
            if single_buffer_weights:
                return pl.BlockSpec(shape, lambda i, j: (0, 0),
                                    pipeline_mode=_BUFFERED(1))
            return pl.BlockSpec(shape, lambda i, j: (0, 0))

        if lora:
            kernel = _lora_qkv_kernel
            in_specs = [x_spec, col_slab((D, tn)), col_slab((1, tn)),
                        resident((D, r_pad)), col_slab((r_pad, tn))]
            scratch = [pltpu.VMEM((tm, r_pad), jnp.float32)]
            # Column axis carries the LoRA-A scratch -> keep it "arbitrary";
            # rows stay "parallel" for megacore.
            dims = ("parallel", "arbitrary")
        else:
            kernel = _base_qkv_kernel
            in_specs = [x_spec, col_slab((D, tn)), col_slab((1, tn))]
            scratch = []
            dims = ("parallel", "parallel")

        return pl.pallas_call(
            kernel,
            out_shape=jax.ShapeDtypeStruct((M, d_pad), out_dtype),
            grid_spec=pltpu.PrefetchScalarGridSpec(
                num_scalar_prefetch=0,
                grid=grid,
                in_specs=in_specs,
                out_specs=out_spec,
                scratch_shapes=scratch),
            compiler_params=pltpu.CompilerParams(
                dimension_semantics=dims,
                vmem_limit_bytes=int(vmem_limit)),
            cost_estimate=pl.CostEstimate(flops=int(flops),
                                          transcendentals=0,
                                          bytes_accessed=int(bytes_accessed)),
        )

    args = (x2, w_p, b_p) + ((wa_cat, wb_cat) if lora else ())
    if _BUFFERED is not None:
        try:
            return build(True)(*args)
        except Exception:
            pass  # Buffered(1) is a pure VMEM optimisation; fall back below.
    return build(False)(*args)


# ------------------------------------------------------------- public entry

def lora_qkv(x, w_qkv, b_qkv, wa_q, wb_q, wa_v, wb_v, *, nh_kd, dh, rank,
             alpha=1.0, compute_dtype=jnp.bfloat16, row_tile=_ROW_TILE_CAP):
    """x: (B, N, D) -> (B, N, 2*nh_kd + dh).  Weights are (in, out)."""
    B, N, D = x.shape
    d_out = 2 * nh_kd + dh
    assert w_qkv.shape == (D, d_out), w_qkv.shape
    assert b_qkv.shape == (d_out,), b_qkv.shape
    assert wa_q.shape == (D, rank) and wb_q.shape == (rank, nh_kd)
    assert wa_v.shape == (D, rank) and wb_v.shape == (rank, dh)
    scaling = float(alpha) / float(rank)
    cd = jnp.dtype(compute_dtype)

    M = B * N
    d_pad = _round_up(d_out, _LANE)     # lane-dense output store
    r_pad = _round_up(2 * rank, _LANE)  # lane-aligned LoRA mid width

    # ---- weight prep: f32 math for scaling/padding, then cast MXU operands.
    w_p = w_qkv.astype(jnp.float32)
    b_p = b_qkv.astype(jnp.float32)
    if d_pad != d_out:
        w_p = jnp.pad(w_p, ((0, 0), (0, d_pad - d_out)))
        b_p = jnp.pad(b_p, (0, d_pad - d_out))
    w_p = w_p.astype(cd)
    b_p = b_p.reshape(1, d_pad)         # bias stays f32 (added to f32 acc)

    wa_cat = jnp.zeros((D, r_pad), jnp.float32)
    wa_cat = wa_cat.at[:, :rank].set(wa_q.astype(jnp.float32))
    wa_cat = wa_cat.at[:, rank:2 * rank].set(wa_v.astype(jnp.float32))
    wa_cat = wa_cat.astype(cd)

    wb_cat = jnp.zeros((r_pad, d_pad), jnp.float32)
    wb_cat = wb_cat.at[:rank, :nh_kd].set(wb_q.astype(jnp.float32) * scaling)
    wb_cat = wb_cat.at[rank:2 * rank, 2 * nh_kd:2 * nh_kd + dh].set(
        wb_v.astype(jnp.float32) * scaling)
    wb_cat = wb_cat.astype(cd)

    x2 = x.reshape(M, D).astype(cd)

    budget = (_vmem_capacity_bytes() * 3) // 4
    tm, tn = _select_tiles(M, D, d_pad, r_pad, cd.itemsize,
                           jnp.dtype(x.dtype).itemsize, row_tile, budget)

    out2 = _qkv_projection(x2, w_p, b_p, wa_cat, wb_cat, out_dtype=x.dtype,
                           tm=tm, tn=tn, vmem_limit=budget)
    if d_pad != d_out:
        out2 = out2[:, :d_out]
    return out2.reshape(B, N, d_out)


def merge_lora_weights(w_qkv, wa_q, wb_q, wa_v, wb_v, *, nh_kd, rank,
                       alpha=1.0):
    """Fold the LoRA delta into the base weight ONCE.  Cache the result and
    reuse it across forward calls (do not rebuild per call)."""
    scaling = float(alpha) / float(rank)
    w = w_qkv.astype(jnp.float32)
    w = w.at[:, :nh_kd].add(
        (wa_q.astype(jnp.float32) @ wb_q.astype(jnp.float32)) * scaling)
    w = w.at[:, 2 * nh_kd:].add(
        (wa_v.astype(jnp.float32) @ wb_v.astype(jnp.float32)) * scaling)
    return w.astype(w_qkv.dtype)


def qkv_merged(x, w_eff, b_qkv, *, compute_dtype=jnp.bfloat16,
               row_tile=_ROW_TILE_CAP):
    """Inference fast path: x @ w_eff + b with pre-merged LoRA weights."""
    B, N, D = x.shape
    d_out = w_eff.shape[1]
    cd = jnp.dtype(compute_dtype)
    M = B * N
    d_pad = _round_up(d_out, _LANE)

    w_p = w_eff.astype(jnp.float32)
    b_p = b_qkv.astype(jnp.float32)
    if d_pad != d_out:
        w_p = jnp.pad(w_p, ((0, 0), (0, d_pad - d_out)))
        b_p = jnp.pad(b_p, (0, d_pad - d_out))
    w_p = w_p.astype(cd)
    b_p = b_p.reshape(1, d_pad)
    x2 = x.reshape(M, D).astype(cd)

    budget = (_vmem_capacity_bytes() * 3) // 4
    tm, tn = _select_tiles(M, D, d_pad, 0, cd.itemsize,
                           jnp.dtype(x.dtype).itemsize, row_tile, budget)

    out2 = _qkv_projection(x2, w_p, b_p, None, None, out_dtype=x.dtype,
                           tm=tm, tn=tn, vmem_limit=budget)
    if d_pad != d_out:
        out2 = out2[:, :d_out]
    return out2.reshape(B, N, d_out)


# ---------------------------------------------------------------- reference

def _reference(x, w_qkv, b_qkv, wa_q, wb_q, wa_v, wb_v, *, nh_kd, dh, rank,
               alpha):
    scaling = alpha / rank
    qkv = x @ w_qkv + b_qkv
    q = qkv[..., :nh_kd] + (x @ wa_q @ wb_q) * scaling
    k = qkv[..., nh_kd:2 * nh_kd]
    v = qkv[..., 2 * nh_kd:] + (x @ wa_v @ wb_v) * scaling
    return jnp.concatenate([q, k, v], axis=-1)


if __name__ == "__main__":
    # Small shapes consistent with the module's forward.
    B, N, D = 2, 8, 32
    nh_kd, dh, rank, alpha = 16, 32, 4, 1.0
    d_out = 2 * nh_kd + dh

    key = jax.random.PRNGKey(0)
    ks = jax.random.split(key, 7)
    x     = jax.random.normal(ks[0], (B, N, D), jnp.float32)
    w_qkv = jax.random.normal(ks[1], (D, d_out), jnp.float32) * 0.05
    b_qkv = jax.random.normal(ks[2], (d_out,), jnp.float32) * 0.05
    wa_q  = jax.random.normal(ks[3], (D, rank), jnp.float32) * 0.05
    wb_q  = jax.random.normal(ks[4], (rank, nh_kd), jnp.float32) * 0.05
    wa_v  = jax.random.normal(ks[5], (D, rank), jnp.float32) * 0.05
    wb_v  = jax.random.normal(ks[6], (rank, dh), jnp.float32) * 0.05

    ref = _reference(x, w_qkv, b_qkv, wa_q, wb_q, wa_v, wb_v,
                     nh_kd=nh_kd, dh=dh, rank=rank, alpha=alpha)

    # 1) Default path: bf16 MXU operands, f32 accumulation.
    out = jax.block_until_ready(
        lora_qkv(x, w_qkv, b_qkv, wa_q, wb_q, wa_v, wb_v,
                 nh_kd=nh_kd, dh=dh, rank=rank, alpha=alpha))
    assert out.shape == (B, N, d_out), out.shape
    assert jnp.allclose(out, ref, atol=2e-2, rtol=2e-2), \
        float(jnp.max(jnp.abs(out - ref)))

    # 2) f32 compute path: tight structural check against the reference.
    out_f32 = jax.block_until_ready(
        lora_qkv(x, w_qkv, b_qkv, wa_q, wb_q, wa_v, wb_v,
                 nh_kd=nh_kd, dh=dh, rank=rank, alpha=alpha,
                 compute_dtype=jnp.float32))
    assert jnp.allclose(out_f32, ref, atol=1e-4, rtol=1e-4), \
        float(jnp.max(jnp.abs(out_f32 - ref)))

    # 3) Merged-LoRA inference fast path (weights folded once, then reused).
    w_eff = merge_lora_weights(w_qkv, wa_q, wb_q, wa_v, wb_v,
                               nh_kd=nh_kd, rank=rank, alpha=alpha)
    out_m = jax.block_until_ready(qkv_merged(x, w_eff, b_qkv))
    assert jnp.allclose(out_m, ref, atol=2e-2, rtol=2e-2), \
        float(jnp.max(jnp.abs(out_m - ref)))

    # 4) Multi-row-tile + ragged last block (M = 300, no wrapper row padding).
    B2, N2 = 3, 100
    x_big = jax.random.normal(jax.random.PRNGKey(1), (B2, N2, D), jnp.float32)
    ref_big = _reference(x_big, w_qkv, b_qkv, wa_q, wb_q, wa_v, wb_v,
                         nh_kd=nh_kd, dh=dh, rank=rank, alpha=alpha)
    out_big = jax.block_until_ready(
        lora_qkv(x_big, w_qkv, b_qkv, wa_q, wb_q, wa_v, wb_v,
                 nh_kd=nh_kd, dh=dh, rank=rank, alpha=alpha))
    assert out_big.shape == (B2, N2, d_out), out_big.shape
    assert jnp.allclose(out_big, ref_big, atol=2e-2, rtol=2e-2), \
        float(jnp.max(jnp.abs(out_big - ref_big)))

    print("KERNEL_OK")
</pallas_src>

<mosaic_0001>
module attributes {stable_mosaic.version = 11 : i64} {
  func.func @_lora_qkv_kernel(%arg0: i32, %arg1: i32, %arg2: memref<8x32xbf16, #tpu.memory_space<vmem>>, %arg3: memref<32x128xbf16, #tpu.memory_space<vmem>>, %arg4: memref<1x128xf32, #tpu.memory_space<vmem>>, %arg5: memref<32x128xbf16, #tpu.memory_space<vmem>>, %arg6: memref<128x128xbf16, #tpu.memory_space<vmem>>, %arg7: memref<8x128xf32, #tpu.memory_space<vmem>>, %arg8: memref<8x128xf32, #tpu.memory_space<vmem>>) attributes {dimension_semantics = [#tpu.dimension_semantics<parallel>, #tpu.dimension_semantics<arbitrary>], iteration_bounds = array<i64: 2, 1>, scalar_prefetch = 0 : i64, scratch_operands = 1 : i64, tpu.core_type = #tpu.core_type<tc>, window_params = [{transform_indices = @transform_0, window_bounds = array<i64: 8, 32>}, {pipeline_mode = #tpu.pipeline_mode<synchronous>, transform_indices = @transform_1, window_bounds = array<i64: 32, 128>}, {pipeline_mode = #tpu.pipeline_mode<synchronous>, transform_indices = @transform_2, window_bounds = array<i64: 1, 128>}, {pipeline_mode = #tpu.pipeline_mode<synchronous>, transform_indices = @transform_3, window_bounds = array<i64: 32, 128>}, {pipeline_mode = #tpu.pipeline_mode<synchronous>, transform_indices = @transform_4, window_bounds = array<i64: 128, 128>}, {transform_indices = @transform_5, window_bounds = array<i64: 8, 128>}]} {
    %c0_i32 = arith.constant 0 : i32
    %0 = arith.cmpi eq, %arg1, %c0_i32 : i32
    %1 = arith.extui %0 : i1 to i32
    %c0_i32_0 = arith.constant 0 : i32
    %2 = arith.cmpi ne, %1, %c0_i32_0 : i32
    scf.if %2 {
      %c0_13 = arith.constant 0 : index
      %c0_14 = arith.constant 0 : index
      %15 = vector.load %arg2[%c0_13, %c0_14] : memref<8x32xbf16, #tpu.memory_space<vmem>>, vector<8x32xbf16>
      %c0_15 = arith.constant 0 : index
      %c0_16 = arith.constant 0 : index
      %16 = vector.load %arg5[%c0_15, %c0_16] : memref<32x128xbf16, #tpu.memory_space<vmem>>, vector<32x128xbf16>
      %cst_17 = arith.constant dense<0.000000e+00> : vector<8x128xf32>
      %17 = tpu.matmul %15, %16, %cst_17 {dimension_numbers = #tpu.dot_dimension_numbers<[1], [0], [0], [1], [0, 0, 1, 1], [], []>} : vector<8x32xbf16>, vector<32x128xbf16>, vector<8x128xf32> -> vector<8x128xf32>
      %c0_18 = arith.constant 0 : index
      %c0_19 = arith.constant 0 : index
      %18 = vector.load %arg8[%c0_18, %c0_19] : memref<8x128xf32, #tpu.memory_space<vmem>>, vector<8x128xf32>
      tpu.vector_store %arg8[%c0_18, %c0_19], %17 {strides = array<i32>} : memref<8x128xf32, #tpu.memory_space<vmem>>, vector<8x128xf32>,
    } else {
    }
    %c0 = arith.constant 0 : index
    %c0_1 = arith.constant 0 : index
    %3 = vector.load %arg2[%c0, %c0_1] : memref<8x32xbf16, #tpu.memory_space<vmem>>, vector<8x32xbf16>
    %c0_2 = arith.constant 0 : index
    %c0_3 = arith.constant 0 : index
    %4 = vector.load %arg3[%c0_2, %c0_3] : memref<32x128xbf16, #tpu.memory_space<vmem>>, vector<32x128xbf16>
    %cst = arith.constant dense<0.000000e+00> : vector<8x128xf32>
    %5 = tpu.matmul %3, %4, %cst {dimension_numbers = #tpu.dot_dimension_numbers<[1], [0], [0], [1], [0, 0, 1, 1], [], []>} : vector<8x32xbf16>, vector<32x128xbf16>, vector<8x128xf32> -> vector<8x128xf32>
    %c0_4 = arith.constant 0 : index
    %c0_5 = arith.constant 0 : index
    %6 = vector.load %arg8[%c0_4, %c0_5] : memref<8x128xf32, #tpu.memory_space<vmem>>, vector<8x128xf32>
    %7 = arith.truncf %6 : vector<8x128xf32> to vector<8x128xbf16>
    %c0_6 = arith.constant 0 : index
    %c0_7 = arith.constant 0 : index
    %8 = vector.load %arg6[%c0_6, %c0_7] : memref<128x128xbf16, #tpu.memory_space<vmem>>, vector<128x128xbf16>
    %cst_8 = arith.constant dense<0.000000e+00> : vector<8x128xf32>
    %9 = tpu.matmul %7, %8, %cst_8 {dimension_numbers = #tpu.dot_dimension_numbers<[1], [0], [0], [1], [0, 0, 1, 1], [], []>} : vector<8x128xbf16>, vector<128x128xbf16>, vector<8x128xf32> -> vector<8x128xf32>
    %10 = arith.addf %5, %9 : vector<8x128xf32>
    %c0_9 = arith.constant 0 : index
    %c0_10 = arith.constant 0 : index
    %11 = vector.load %arg4[%c0_9, %c0_10] : memref<1x128xf32, #tpu.memory_space<vmem>>, vector<1x128xf32>
    %12 = vector.broadcast %11 : vector<1x128xf32> to vector<8x128xf32>
    %13 = arith.addf %10, %12 : vector<8x128xf32>
    %c0_11 = arith.constant 0 : index
    %c0_12 = arith.constant 0 : index
    %14 = vector.load %arg7[%c0_11, %c0_12] : memref<8x128xf32, #tpu.memory_space<vmem>>, vector<8x128xf32>
    tpu.vector_store %arg7[%c0_11, %c0_12], %13 {strides = array<i32>} : memref<8x128xf32, #tpu.memory_space<vmem>>, vector<8x128xf32>,
    return
  }
  func.func @transform_0(%arg0: i32, %arg1: i32) -> (i32, i32) {
    %c0_i32 = arith.constant 0 : i32
    %c0_i32_0 = arith.constant 0 : i32
    return %arg0, %c0_i32 : i32, i32
  }
  func.func @transform_1(%arg0: i32, %arg1: i32) -> (i32, i32) {
    %c0_i32 = arith.constant 0 : i32
    %c0_i32_0 = arith.constant 0 : i32
    return %c0_i32, %arg1 : i32, i32
  }
  func.func @transform_2(%arg0: i32, %arg1: i32) -> (i32, i32) {
    %c0_i32 = arith.constant 0 : i32
    %c0_i32_0 = arith.constant 0 : i32
    return %c0_i32, %arg1 : i32, i32
  }
  func.func @transform_3(%arg0: i32, %arg1: i32) -> (i32, i32) {
    %c0_i32 = arith.constant 0 : i32
    %c0_i32_0 = arith.constant 0 : i32
    %c0_i32_1 = arith.constant 0 : i32
    return %c0_i32, %c0_i32_0 : i32, i32
  }
  func.func @transform_4(%arg0: i32, %arg1: i32) -> (i32, i32) {
    %c0_i32 = arith.constant 0 : i32
    %c0_i32_0 = arith.constant 0 : i32
    return %c0_i32, %arg1 : i32, i32
  }
  func.func @transform_5(%arg0: i32, %arg1: i32) -> (i32, i32) {
    %c0_i32 = arith.constant 0 : i32
    return %arg0, %arg1 : i32, i32
  }
}

module attributes {stable_mosaic.version = 11 : i64} {
  func.func @_lora_qkv_kernel(%arg0: i32, %arg1: i32, %arg2: memref<8x32xbf16, #tpu.memory_space<vmem>>, %arg3: memref<32x128xbf16, #tpu.memory_space<vmem>>, %arg4: memref<1x128xf32, #tpu.memory_space<vmem>>, %arg5: memref<32x128xbf16, #tpu.memory_space<vmem>>, %arg6: memref<128x128xbf16, #tpu.memory_space<vmem>>, %arg7: memref<8x128xf32, #tpu.memory_space<vmem>>, %arg8: memref<8x128xf32, #tpu.memory_space<vmem>>) attributes {dimension_semantics = [#tpu.dimension_semantics<parallel>, #tpu.dimension_semantics<arbitrary>], iteration_bounds = array<i64: 2, 1>, scalar_prefetch = 0 : i64, scratch_operands = 1 : i64, tpu.core_type = #tpu.core_type<tc>, window_params = [{transform_indices = @transform_0, window_bounds = array<i64: 8, 32>}, {transform_indices = @transform_1, window_bounds = array<i64: 32, 128>}, {transform_indices = @transform_2, window_bounds = array<i64: 1, 128>}, {pipeline_mode = #tpu.pipeline_mode<synchronous>, transform_indices = @transform_3, window_bounds = array<i64: 32, 128>}, {transform_indices = @transform_4, window_bounds = array<i64: 128, 128>}, {transform_indices = @transform_5, window_bounds = array<i64: 8, 128>}]} {
    %c0_i32 = arith.constant 0 : i32
    %0 = arith.cmpi eq, %arg1, %c0_i32 : i32
    %1 = arith.extui %0 : i1 to i32
    %c0_i32_0 = arith.constant 0 : i32
    %2 = arith.cmpi ne, %1, %c0_i32_0 : i32
    scf.if %2 {
      %c0_13 = arith.constant 0 : index
      %c0_14 = arith.constant 0 : index
      %15 = vector.load %arg2[%c0_13, %c0_14] : memref<8x32xbf16, #tpu.memory_space<vmem>>, vector<8x32xbf16>
      %c0_15 = arith.constant 0 : index
      %c0_16 = arith.constant 0 : index
      %16 = vector.load %arg5[%c0_15, %c0_16] : memref<32x128xbf16, #tpu.memory_space<vmem>>, vector<32x128xbf16>
      %cst_17 = arith.constant dense<0.000000e+00> : vector<8x128xf32>
      %17 = tpu.matmul %15, %16, %cst_17 {dimension_numbers = #tpu.dot_dimension_numbers<[1], [0], [0], [1], [0, 0, 1, 1], [], []>} : vector<8x32xbf16>, vector<32x128xbf16>, vector<8x128xf32> -> vector<8x128xf32>
      %c0_18 = arith.constant 0 : index
      %c0_19 = arith.constant 0 : index
      %18 = vector.load %arg8[%c0_18, %c0_19] : memref<8x128xf32, #tpu.memory_space<vmem>>, vector<8x128xf32>
      tpu.vector_store %arg8[%c0_18, %c0_19], %17 {strides = array<i32>} : memref<8x128xf32, #tpu.memory_space<vmem>>, vector<8x128xf32>,
    } else {
    }
    %c0 = arith.constant 0 : index
    %c0_1 = arith.constant 0 : index
    %3 = vector.load %arg2[%c0, %c0_1] : memref<8x32xbf16, #tpu.memory_space<vmem>>, vector<8x32xbf16>
    %c0_2 = arith.constant 0 : index
    %c0_3 = arith.constant 0 : index
    %4 = vector.load %arg3[%c0_2, %c0_3] : memref<32x128xbf16, #tpu.memory_space<vmem>>, vector<32x128xbf16>
    %cst = arith.constant dense<0.000000e+00> : vector<8x128xf32>
    %5 = tpu.matmul %3, %4, %cst {dimension_numbers = #tpu.dot_dimension_numbers<[1], [0], [0], [1], [0, 0, 1, 1], [], []>} : vector<8x32xbf16>, vector<32x128xbf16>, vector<8x128xf32> -> vector<8x128xf32>
    %c0_4 = arith.constant 0 : index
    %c0_5 = arith.constant 0 : index
    %6 = vector.load %arg8[%c0_4, %c0_5] : memref<8x128xf32, #tpu.memory_space<vmem>>, vector<8x128xf32>
    %7 = arith.truncf %6 : vector<8x128xf32> to vector<8x128xbf16>
    %c0_6 = arith.constant 0 : index
    %c0_7 = arith.constant 0 : index
    %8 = vector.load %arg6[%c0_6, %c0_7] : memref<128x128xbf16, #tpu.memory_space<vmem>>, vector<128x128xbf16>
    %cst_8 = arith.constant dense<0.000000e+00> : vector<8x128xf32>
    %9 = tpu.matmul %7, %8, %cst_8 {dimension_numbers = #tpu.dot_dimension_numbers<[1], [0], [0], [1], [0, 0, 1, 1], [], []>} : vector<8x128xbf16>, vector<128x128xbf16>, vector<8x128xf32> -> vector<8x128xf32>
    %10 = arith.addf %5, %9 : vector<8x128xf32>
    %c0_9 = arith.constant 0 : index
    %c0_10 = arith.constant 0 : index
    %11 = vector.load %arg4[%c0_9, %c0_10] : memref<1x128xf32, #tpu.memory_space<vmem>>, vector<1x128xf32>
    %12 = vector.broadcast %11 : vector<1x128xf32> to vector<8x128xf32>
    %13 = arith.addf %10, %12 : vector<8x128xf32>
    %c0_11 = arith.constant 0 : index
    %c0_12 = arith.constant 0 : index
    %14 = vector.load %arg7[%c0_11, %c0_12] : memref<8x128xf32, #tpu.memory_space<vmem>>, vector<8x128xf32>
    tpu.vector_store %arg7[%c0_11, %c0_12], %13 {strides = array<i32>} : memref<8x128xf32, #tpu.memory_space<vmem>>, vector<8x128xf32>,
    return
  }
  func.func @transform_0(%arg0: i32, %arg1: i32) -> (i32, i32) {
    %c0_i32 = arith.constant 0 : i32
    %c0_i32_0 = arith.constant 0 : i32
    return %arg0, %c0_i32 : i32, i32
  }
  func.func @transform_1(%arg0: i32, %arg1: i32) -> (i32, i32) {
    %c0_i32 = arith.constant 0 : i32
    %c0_i32_0 = arith.constant 0 : i32
    return %c0_i32, %arg1 : i32, i32
  }
  func.func @transform_2(%arg0: i32, %arg1: i32) -> (i32, i32) {
    %c0_i32 = arith.constant 0 : i32
    %c0_i32_0 = arith.constant 0 : i32
    return %c0_i32, %arg1 : i32, i32
  }
  func.func @transform_3(%arg0: i32, %arg1: i32) -> (i32, i32) {
    %c0_i32 = arith.constant 0 : i32
    %c0_i32_0 = arith.constant 0 : i32
    %c0_i32_1 = arith.constant 0 : i32
    return %c0_i32, %c0_i32_0 : i32, i32
  }
  func.func @transform_4(%arg0: i32, %arg1: i32) -> (i32, i32) {
    %c0_i32 = arith.constant 0 : i32
    %c0_i32_0 = arith.constant 0 : i32
    return %c0_i32, %arg1 : i32, i32
  }
  func.func @transform_5(%arg0: i32, %arg1: i32) -> (i32, i32) {
    %c0_i32 = arith.constant 0 : i32
    return %arg0, %arg1 : i32, i32
  }
}

</mosaic_0001>

<bundles_post_ra>
// kernel: tpu_custom_call.1
= control target key start
LH: loop header
LB: loop body
LE: loop exit
PB: predicated region body
PF: predicated region fallthrough
CT: control target
= control target key end

     0   :  { %10 = vsyncpa [#allocation4], 0  ;;  %s1230_s0 = inlined_call_operand.hbm [shape: bf16[16,32], index: 0, kind: input, shape index: {}]   ;;  %s1231_s1 = inlined_call_operand.hbm [shape: bf16[32,128], index: 1, kind: input, shape index: {}]   ;;  %s1232_s2 = inlined_call_operand.vmem [shape: f32[1,128], index: 2, kind: input, shape index: {}]   ;;  %s1233_s3 = inlined_call_operand.hbm [shape: bf16[32,128], index: 3, kind: input, shape index: {}]   ;;  %s1234_s4 = inlined_call_operand.hbm [shape: bf16[128,128], index: 4, kind: input, shape index: {}]   ;;  %s1235_s5 = inlined_call_operand.hbm [shape: f32[16,128], index: 5, kind: output, shape index: {}]  }
   0x1   :  { %12 = vsyncpa [#allocation4 + $0x1], 0 }
   0x2   :  { %13 = vsyncpa [#allocation7], 0 }
   0x3   :  { %14 = vsyncpa [#allocation10], 0 }
   0x4   :  { %15 = vsyncpa [#allocation5], 0 }
   0x5   :  { %17 = vsyncpa [#allocation5 + $0x1], 0  ;;  %s1059_s18 = smov 0   ;;  %s1061_s19 = smov 0  }
   0x6   :  { %s1063_s20 = smov 0   ;;  %s1065_s21 = smov 0  }
   0x7   :  { %s1067_s22 = smov 0   ;;  %s1069_s23 = smov 0  }
   0x8 LB: > { %s634_s24 = sadd.s32 4294967295, %s1022_s23   ;;  %p636_p0 = scmp.ge.s32.totalorder %s1022_s23, 1  ;;  %s1022_s23 = sphi %s1069_s23, %s23_s23   ;;  %s1018_s22 = sphi %s1067_s22, %s1247_s22   ;;  %s1014_s21 = sphi %s1065_s21, %s1246_s21   ;;  %s1010_s20 = sphi %s1063_s20, %s1245_s20   ;;  %s1006_s19 = sphi %s1061_s19, %s1244_s19   ;;  %s1002_s18 = sphi %s1059_s18, %s1243_s18  }
   0x9   : > { %p1093_p1 = scmp.eq.s32.totalorder %s634_s24, 0  ;;  %p193_p2 = scmp.lt.s32.totalorder %s1022_s23, 3 }
   0xa   : > { %s206_s28 = sshll.u32 %s1231_s1, 4  ;;  %s1024_s30 = smov [#allocation6]   ;;  %s207_s28 = int_to_ptr.hbm [resolvable:$true] %s206_s28 }
   0xb   : > { %p1101_p3 = pnand %p636_p0, %p193_p2  ;;  %s208_s6 = sshll.u32 %s1024_s30, 4  ;;  %s209_s6 = int_to_ptr.vmem [resolvable:$true] %s208_s6 }
   0xc   : > { %p641_p6 = scmp.ge.s32.totalorder %s1022_s23, 2  ;;  %s226_s10 = sshll.u32 %s1233_s3, 4  ;;  %s227_s10 = int_to_ptr.hbm [resolvable:$true] %s226_s10 }
   0xd   : > { %p732_p4 = pneg %p1101_p3  ;;  %s1025_s11 = smov 64  }
   0xe   : > { %s1026_s12 = smov 4   ;;  %s1027_s13 = smov [#allocation8]  }
   0xf   : > { %p1109_p5 = pnand %p732_p4, %p1093_p1  ;;  %s228_s14 = sshll.u32 %s1027_s13, 4  ;;  %s229_s14 = int_to_ptr.vmem [resolvable:$true] %s228_s14 }
  0x10   : > { %s242_s17 = sshll.u32 %s1234_s4, 4  ;;  %s1028_s26 = smov [#allocation9]   ;;  %s243_s17 = int_to_ptr.hbm [resolvable:$true] %s242_s17 }
  0x11   : > { %735 = dma.hbm_to_vmem [thread:$0]  (!%p1109_p5), %s207_s28, 256, %s209_s6, [#allocation7], %s1025_s11, %s1025_s11, %s1026_s12  }
  0x12   : > { %738 = dma.hbm_to_vmem [thread:$0]  (!%p1109_p5), %s227_s10, 256, %s229_s14, [#allocation7], %s1025_s11, %s1025_s11, %s1026_s12  }
  0x13   : > { %s244_s27 = sshll.u32 %s1028_s26, 4  ;;  %s635_s28 = sadd.s32 4294967294, %s1022_s23   ;;  %s245_s27 = int_to_ptr.vmem [resolvable:$true] %s244_s27 }
  0x14   : > { %741 = dma.hbm_to_vmem [thread:$0]  (!%p1109_p5), %s243_s17, 1024, %s245_s27, [#allocation10], %s1025_s11, %s1025_s11, %s1026_s12  }
  0x15   : > { %s35_s30 = sadd.s32 1, %s1018_s22  ;;  %s42_s6 = sadd.s32 1, %s1010_s20 }
  0x16   : > { %p37_p7 = scmp.ge.s32.totalorder %s35_s30, 2  ;;  %p49_p8 = scmp.ne.s32.totalorder %s1010_s20, %s1006_s19 }
  0x17   : > { %p50_p9 = scmp.eq.s32.totalorder %s1022_s23, 0  ;;  %p55_p10 = scmp.ne.s32.totalorder %s1006_s19, %s1002_s18 }
  0x18   : > { %s1249_s30 = smov (%p37_p7, %s35_s30), 0  ;;  %p180_p13 = scmp.eq.s32.totalorder %s634_s24, 1 }
  0x19   : > { %p1136_p11 = por %p50_p9, %p49_p8  ;;  %p1142_p12 = por %p1093_p1, %p55_p10 }
  0x1a   : > { %s39_s9 = ssub.s32 %s1018_s22, %s1249_s30  ;;  %p186_p2 = scmp.eq.s32.totalorder %s635_s28, 1 }
  0x1b   : > { %p40_p0 = scmp.eq.s32.totalorder %s39_s9, 0  ;;  %p1150_p4 = por %p180_p13, %p49_p8 }
  0x1c   : > { %p753_p5 = scmp.lt.s32.totalorder %s1022_s23, 2  ;;  %p1158_p7 = por %p186_p2, %p55_p10 }
  0x1d   : > { %s1156_s11 = scalar_select %p40_p0, %s1010_s20, %s42_s6  }
  0x1e   : > { %s258_s13 = sand.u32 1, %s1010_s20   ;;  %s643_s15 = sshll.u32 %s1018_s22, 2 }
  0x1f   : > { %s642_s14 = sshll.u32 %s258_s13, 2  ;;  %s266_s24 = scalar_lea.hbm %s1230_s0, %s643_s15 }
  0x20   : > { %s262_s26 = scalar_lea.vmem [#allocation3], %s642_s14  ;;  %s268_s28 = sshll.u32 %s266_s24, 4  ;;  %s269_s28 = int_to_ptr.hbm [resolvable:$true] %s268_s28 }
  0x21   : > { %s270_s27 = sshll.u32 %s262_s26, 4  ;;  %p743_p8 = pnand %p753_p5, %p1136_p11  ;;  %s271_s27 = int_to_ptr.vmem [resolvable:$true] %s270_s27 }
  0x22   : > { %s259_s6 = scalar_lea.sflag [#allocation4], %s258_s13  ;;  %279 = sbr.rel (%p1101_p3) target bundleno = 314 (0x13a), region = 40 }
  0x23   : > { %745 = dma.hbm_to_vmem [thread:$0]  (!%p743_p8), %s269_s28, 64, %s271_s27, %s259_s6  }
  0x24   : > { %s1172_s9 = sand.u32 (!%p1101_p3), 1, %s1006_s19  }
  0x25   : > { %s645_s16 = sshll.u32 (!%p1101_p3), %s1172_s9, 2  ;;  %s282_s15 = scalar_lea.sflag (!%p1101_p3), [#allocation4], %s1172_s9 }
  0x26   : > { %s285_s14 = scalar_lea.vmem (!%p1101_p3), [#allocation3], %s645_s16 }
  0x27   : > { %985 = dma.done.wait (%p1142_p12), %s282_s15, 64  }
  0x28   : > { %987 = vsyncadd (%p1142_p12), %s282_s15, 4294967232 }
  0x29   : > { %989 = dma.done.wait (%p1093_p1), [#allocation7], 512  }
  0x2a   : > { %991 = vsyncadd (%p1093_p1), [#allocation7], 4294966784 }
  0x2b   : > { %993 = dma.done.wait (%p1093_p1), [#allocation10], 1024  }
  0x2c   : > { %995 = vsyncadd (%p1093_p1), [#allocation10], 4294966272  ;;  %v705_v0 = vld [vmem:[#allocation8 + $0x8] sm:$0xff]  ;;  %v704_v2 = vld [vmem:[#allocation8] sm:$0xff]  ;;  %vm356_vm0 = vcmask 261120   ;;  %s649_s25 = sshll.u32 %s1172_s9, 3 }
  0x2d   : > { %v715_v1 = vld [vmem:[#allocation9 + $0x38] sm:$0xff]  ;;  %366 = vmatpush.bf16.msra.mxu0 %v705_v0  ;;  %v707_v3 = vld [vmem:[#allocation6 + $0x8] sm:$0xff]  ;;  %v714_v4 = vld [vmem:[#allocation9 + $0x30] sm:$0xff]  ;;  %s701_s29 = sshll.u32 %s1014_s21, 3  ;;  %s330_s26 = scalar_lea.vmem [#allocation11], %s649_s25 }
  0x2e   : > { %445 = vmatpush.bf16.msra.mxu1 %v715_v1  ;;  %480 = vmatpush.bf16.msra.mxu2 %v707_v3  ;;  %v706_v5 = vld [vmem:[#allocation6] sm:$0xff]  ;;  %v339_v6 = vld [vmem:[%s285_s14] sm:$0xf]  ;;  %v713_v7 = vld [vmem:[#allocation9 + $0x28] sm:$0xff]  ;;  %s505_s13 = scalar_lea.hbm %s1235_s5, %s701_s29  ;;  %s507_s27 = sshll.u32 %s330_s26, 4  ;;  %s508_s27 = int_to_ptr.vmem [resolvable:$true] %s507_s27 }
  0x2f   : > { %v374_v8 = vld [vmem:[%s285_s14] sm:$0xf]  ;;  %v712_v9 = vld [vmem:[#allocation9 + $0x20] sm:$0xff]  ;;  %v710_v11 = vld [vmem:[#allocation9 + $0x10] sm:$0xff]  ;;  %s509_s28 = sshll.u32 %s505_s13, 4  ;;  %s494_s6 = scalar_lea.sflag [#allocation5], %s1172_s9  ;;  %s510_s28 = int_to_ptr.hbm [resolvable:$true] %s509_s28 }
  0x30   : > { %v711_v10 = vld [vmem:[#allocation9 + $0x18] sm:$0xff]  ;;  %v709_v12 = vld [vmem:[#allocation9 + $0x8] sm:$0xff]  ;;  %v708_v13 = vld [vmem:[#allocation9] sm:$0xff]  ;;  %s946_s21 = sshra.s32 %s510_s28, 4  ;;  %s952_s29 = scalar_lea.hbm %s1235_s5, 16  ;;  %s947_s21 = int_to_ptr.hbm [resolvable:$true] %s946_s21 }
  0x31   : > { %367 = vmatpush.bf16.msra.mxu0 %v704_v2  ;;  %v811_v19 = vld [vmem:[%s1232_s2] ss:$0 sm:$0xff]  ;;  %s948_s16 = scalar_lea.hbm %s947_s21, 8  ;;  %p953_p10 = scmp.lt.s32.totalorder %s947_s21, %s1235_s5 }
  0x32   : > { %446 = vmatpush.bf16.msra.mxu1 %v714_v4  ;;  %481 = vmatpush.bf16.msra.mxu2 %v706_v5  ;;  %p949_p1 = scmp.ne.s32.totalorder %s947_s21, %s948_s16  ;;  %p954_p11 = scmp.lt.s32.totalorder %s952_s29, %s948_s16 }
  0x34   : > { %658 = vmatmul.msk.bf16.vlgmr.msra.gmra.mxu0 %vm356_vm0, %v339_v6  ;;  %p950_p3 = pnand %p949_p1, %p1150_p4  ;;  %p955_p12 = por %p954_p11, %p953_p10 }
  0x35   : > { %699 = vmatmul.msk.bf16.vlgmr.msra.gmra.mxu2 %vm356_vm0, %v374_v8 }
  0x36   : > { %447 = vmatpush.bf16.msra.mxu1 %v713_v7  ;;  %p951_p9 = pneg %p950_p3 }
  0x38   : > { %p956_p13 = pnand %p955_p12, %p951_p9 }
  0x3a   : > { %448 = vmatpush.bf16.msra.mxu1 %v712_v9 }
  0x3e   : > { %449 = vmatpush.bf16.msra.mxu1 %v711_v10 }
  0x42   : > { %450 = vmatpush.bf16.msra.mxu1 %v710_v11 }
  0x46   : > { %451 = vmatpush.bf16.msra.mxu1 %v709_v12 }
  0x4a   : > { %452 = vmatpush.bf16.msra.mxu1 %v708_v13 }
  0xb1   : > { %v369_v14 = vpop.f32.mrf.mxu0 }
  0xb2   : > { %v380_v15 = vpack.c.bf16 %v369_v14, %v369_v14 }
  0xb4   : > { %453 = vmatmul.bf16.vlgmr.msra.gmra.mxu1 %v380_v15 }
  0xb8   : > { %v483_v17 = vpop.f32.mrf.mxu2 }
  0xb9   : > { %v371_v16 = vpop.f32.mrf.mxu0 }
  0xc0   : > { %v485_v18 = vpop.f32.mrf.mxu2 }
 0x131   : > { %v454_v20 = vpop.f32.mrf.mxu1 }
 0x132   : > { %v484_v21 = vadd.f32 %v483_v17, %v454_v20 }
 0x134   : > { %v491_v22 = vadd.f32 %v811_v19, %v484_v21 }
 0x136   : > { %492 = vst [vmem:[%s330_s26] sm:$0xff] %v491_v22 }
 0x137   : > { %959 = shalt.err (!%p956_p13)
}
 0x138   : > { %730 = dma.vmem_to_hbm [thread:$0]  (%p1150_p4), %s508_s27, 128, %s510_s28, %s494_s6  }
 0x139   : > { %v456_v23 = vpop.f32.mrf.mxu1 }
 0x13a PF: > { %s521_s9 = sand.u32 1, %s1002_s18   ;;  %p747_p0 = pnand %p641_p6, %p1158_p7 }
 0x13b   : > { %s522_s7 = scalar_lea.sflag [#allocation5], %s521_s9 }
 0x13c   : > { %p748_p2 = pneg %p747_p0 }
 0x13e   : > { %997 = dma.done.wait (%p748_p2), %s522_s7, 128  }
 0x13f   : > { %999 = vsyncadd (%p748_p2), %s522_s7, 4294967168  ;;  %s23_s23 = sadd.s32 1, %s1022_s23   ;;  %s1243_s18 = smov %s1006_s19 }
 0x140   : > { %p20_p5 = scmp.ge.s32.totalorder %s23_s23, 4   ;;  %s1244_s19 = smov %s1010_s20 }
 0x141   : > { %s1245_s20 = smov %s1156_s11  ;;  %s1246_s21 = smov %s1018_s22 }
 0x142   : > { %s1247_s22 = smov %s1249_s30  ;;  %22 = sbr.rel (!%p20_p5) target bundleno = 8 (0x8), region = 106 }
 0x147   :  { %528 = vsyncpa [#allocation4], 1 }
 0x148   :  { %530 = vsyncpa [#allocation4 + $0x1], 1 }
 0x149   :  { %531 = vsyncpa [#allocation7], 1 }
 0x14a   :  { %532 = vsyncpa [#allocation10], 1 }
 0x14b   :  { %533 = vsyncpa [#allocation5], 1 }
 0x14c   :  { %535 = vsyncpa [#allocation5 + $0x1], 1 }

// kernel: tpu_custom_call.1
= control target key start
LH: loop header
LB: loop body
LE: loop exit
PB: predicated region body
PF: predicated region fallthrough
CT: control target
= control target key end

     0   :  { %10 = vsyncpa [#allocation4], 0  ;;  %s1230_s0 = inlined_call_operand.hbm [shape: bf16[16,32], index: 0, kind: input, shape index: {}]   ;;  %s1231_s1 = inlined_call_operand.hbm [shape: bf16[32,128], index: 1, kind: input, shape index: {}]   ;;  %s1232_s2 = inlined_call_operand.vmem [shape: f32[1,128], index: 2, kind: input, shape index: {}]   ;;  %s1233_s3 = inlined_call_operand.hbm [shape: bf16[32,128], index: 3, kind: input, shape index: {}]   ;;  %s1234_s4 = inlined_call_operand.hbm [shape: bf16[128,128], index: 4, kind: input, shape index: {}]   ;;  %s1235_s5 = inlined_call_operand.hbm [shape: f32[16,128], index: 5, kind: output, shape index: {}]  }
   0x1   :  { %12 = vsyncpa [#allocation4 + $0x1], 0 }
   0x2   :  { %13 = vsyncpa [#allocation7], 0 }
   0x3   :  { %14 = vsyncpa [#allocation10], 0 }
   0x4   :  { %15 = vsyncpa [#allocation5], 0 }
   0x5   :  { %17 = vsyncpa [#allocation5 + $0x1], 0  ;;  %s1059_s18 = smov 0   ;;  %s1061_s19 = smov 0  }
   0x6   :  { %s1063_s20 = smov 0   ;;  %s1065_s21 = smov 0  }
   0x7   :  { %s1067_s22 = smov 0   ;;  %s1069_s23 = smov 0  }
   0x8 LB: > { %s634_s24 = sadd.s32 4294967295, %s1022_s23   ;;  %p636_p0 = scmp.ge.s32.totalorder %s1022_s23, 1  ;;  %s1022_s23 = sphi %s1069_s23, %s23_s23   ;;  %s1018_s22 = sphi %s1067_s22, %s1247_s22   ;;  %s1014_s21 = sphi %s1065_s21, %s1246_s21   ;;  %s1010_s20 = sphi %s1063_s20, %s1245_s20   ;;  %s1006_s19 = sphi %s1061_s19, %s1244_s19   ;;  %s1002_s18 = sphi %s1059_s18, %s1243_s18  }
   0x9   : > { %p1093_p1 = scmp.eq.s32.totalorder %s634_s24, 0  ;;  %p193_p2 = scmp.lt.s32.totalorder %s1022_s23, 3 }
   0xa   : > { %s206_s28 = sshll.u32 %s1231_s1, 4  ;;  %s1024_s30 = smov [#allocation6]   ;;  %s207_s28 = int_to_ptr.hbm [resolvable:$true] %s206_s28 }
   0xb   : > { %p1101_p3 = pnand %p636_p0, %p193_p2  ;;  %s208_s6 = sshll.u32 %s1024_s30, 4  ;;  %s209_s6 = int_to_ptr.vmem [resolvable:$true] %s208_s6 }
   0xc   : > { %p641_p6 = scmp.ge.s32.totalorder %s1022_s23, 2  ;;  %s226_s10 = sshll.u32 %s1233_s3, 4  ;;  %s227_s10 = int_to_ptr.hbm [resolvable:$true] %s226_s10 }
   0xd   : > { %p732_p4 = pneg %p1101_p3  ;;  %s1025_s11 = smov 64  }
   0xe   : > { %s1026_s12 = smov 4   ;;  %s1027_s13 = smov [#allocation8]  }
   0xf   : > { %p1109_p5 = pnand %p732_p4, %p1093_p1  ;;  %s228_s14 = sshll.u32 %s1027_s13, 4  ;;  %s229_s14 = int_to_ptr.vmem [resolvable:$true] %s228_s14 }
  0x10   : > { %s242_s17 = sshll.u32 %s1234_s4, 4  ;;  %s1028_s26 = smov [#allocation9]   ;;  %s243_s17 = int_to_ptr.hbm [resolvable:$true] %s242_s17 }
  0x11   : > { %735 = dma.hbm_to_vmem [thread:$0]  (!%p1109_p5), %s207_s28, 256, %s209_s6, [#allocation7], %s1025_s11, %s1025_s11, %s1026_s12  }
  0x12   : > { %738 = dma.hbm_to_vmem [thread:$0]  (!%p1109_p5), %s227_s10, 256, %s229_s14, [#allocation7], %s1025_s11, %s1025_s11, %s1026_s12  }
  0x13   : > { %s244_s27 = sshll.u32 %s1028_s26, 4  ;;  %s635_s28 = sadd.s32 4294967294, %s1022_s23   ;;  %s245_s27 = int_to_ptr.vmem [resolvable:$true] %s244_s27 }
  0x14   : > { %741 = dma.hbm_to_vmem [thread:$0]  (!%p1109_p5), %s243_s17, 1024, %s245_s27, [#allocation10], %s1025_s11, %s1025_s11, %s1026_s12  }
  0x15   : > { %s35_s30 = sadd.s32 1, %s1018_s22  ;;  %s42_s6 = sadd.s32 1, %s1010_s20 }
  0x16   : > { %p37_p7 = scmp.ge.s32.totalorder %s35_s30, 2  ;;  %p49_p8 = scmp.ne.s32.totalorder %s1010_s20, %s1006_s19 }
  0x17   : > { %p50_p9 = scmp.eq.s32.totalorder %s1022_s23, 0  ;;  %p55_p10 = scmp.ne.s32.totalorder %s1006_s19, %s1002_s18 }
  0x18   : > { %s1249_s30 = smov (%p37_p7, %s35_s30), 0  ;;  %p180_p13 = scmp.eq.s32.totalorder %s634_s24, 1 }
  0x19   : > { %p1136_p11 = por %p50_p9, %p49_p8  ;;  %p1142_p12 = por %p1093_p1, %p55_p10 }
  0x1a   : > { %s39_s9 = ssub.s32 %s1018_s22, %s1249_s30  ;;  %p186_p2 = scmp.eq.s32.totalorder %s635_s28, 1 }
  0x1b   : > { %p40_p0 = scmp.eq.s32.totalorder %s39_s9, 0  ;;  %p1150_p4 = por %p180_p13, %p49_p8 }
  0x1c   : > { %p753_p5 = scmp.lt.s32.totalorder %s1022_s23, 2  ;;  %p1158_p7 = por %p186_p2, %p55_p10 }
  0x1d   : > { %s1156_s11 = scalar_select %p40_p0, %s1010_s20, %s42_s6  }
  0x1e   : > { %s258_s13 = sand.u32 1, %s1010_s20   ;;  %s643_s15 = sshll.u32 %s1018_s22, 2 }
  0x1f   : > { %s642_s14 = sshll.u32 %s258_s13, 2  ;;  %s266_s24 = scalar_lea.hbm %s1230_s0, %s643_s15 }
  0x20   : > { %s262_s26 = scalar_lea.vmem [#allocation3], %s642_s14  ;;  %s268_s28 = sshll.u32 %s266_s24, 4  ;;  %s269_s28 = int_to_ptr.hbm [resolvable:$true] %s268_s28 }
  0x21   : > { %s270_s27 = sshll.u32 %s262_s26, 4  ;;  %p743_p8 = pnand %p753_p5, %p1136_p11  ;;  %s271_s27 = int_to_ptr.vmem [resolvable:$true] %s270_s27 }
  0x22   : > { %s259_s6 = scalar_lea.sflag [#allocation4], %s258_s13  ;;  %279 = sbr.rel (%p1101_p3) target bundleno = 314 (0x13a), region = 40 }
  0x23   : > { %745 = dma.hbm_to_vmem [thread:$0]  (!%p743_p8), %s269_s28, 64, %s271_s27, %s259_s6  }
  0x24   : > { %s1172_s9 = sand.u32 (!%p1101_p3), 1, %s1006_s19  }
  0x25   : > { %s645_s16 = sshll.u32 (!%p1101_p3), %s1172_s9, 2  ;;  %s282_s15 = scalar_lea.sflag (!%p1101_p3), [#allocation4], %s1172_s9 }
  0x26   : > { %s285_s14 = scalar_lea.vmem (!%p1101_p3), [#allocation3], %s645_s16 }
  0x27   : > { %985 = dma.done.wait (%p1142_p12), %s282_s15, 64  }
  0x28   : > { %987 = vsyncadd (%p1142_p12), %s282_s15, 4294967232 }
  0x29   : > { %989 = dma.done.wait (%p1093_p1), [#allocation7], 512  }
  0x2a   : > { %991 = vsyncadd (%p1093_p1), [#allocation7], 4294966784 }
  0x2b   : > { %993 = dma.done.wait (%p1093_p1), [#allocation10], 1024  }
  0x2c   : > { %995 = vsyncadd (%p1093_p1), [#allocation10], 4294966272  ;;  %v705_v0 = vld [vmem:[#allocation8 + $0x8] sm:$0xff]  ;;  %v704_v2 = vld [vmem:[#allocation8] sm:$0xff]  ;;  %vm356_vm0 = vcmask 261120   ;;  %s649_s25 = sshll.u32 %s1172_s9, 3 }
  0x2d   : > { %v715_v1 = vld [vmem:[#allocation9 + $0x38] sm:$0xff]  ;;  %366 = vmatpush.bf16.msra.mxu0 %v705_v0  ;;  %v707_v3 = vld [vmem:[#allocation6 + $0x8] sm:$0xff]  ;;  %v714_v4 = vld [vmem:[#allocation9 + $0x30] sm:$0xff]  ;;  %s701_s29 = sshll.u32 %s1014_s21, 3  ;;  %s330_s26 = scalar_lea.vmem [#allocation11], %s649_s25 }
  0x2e   : > { %445 = vmatpush.bf16.msra.mxu1 %v715_v1  ;;  %480 = vmatpush.bf16.msra.mxu2 %v707_v3  ;;  %v706_v5 = vld [vmem:[#allocation6] sm:$0xff]  ;;  %v339_v6 = vld [vmem:[%s285_s14] sm:$0xf]  ;;  %v713_v7 = vld [vmem:[#allocation9 + $0x28] sm:$0xff]  ;;  %s505_s13 = scalar_lea.hbm %s1235_s5, %s701_s29  ;;  %s507_s27 = sshll.u32 %s330_s26, 4  ;;  %s508_s27 = int_to_ptr.vmem [resolvable:$true] %s507_s27 }
  0x2f   : > { %v374_v8 = vld [vmem:[%s285_s14] sm:$0xf]  ;;  %v712_v9 = vld [vmem:[#allocation9 + $0x20] sm:$0xff]  ;;  %v710_v11 = vld [vmem:[#allocation9 + $0x10] sm:$0xff]  ;;  %s509_s28 = sshll.u32 %s505_s13, 4  ;;  %s494_s6 = scalar_lea.sflag [#allocation5], %s1172_s9  ;;  %s510_s28 = int_to_ptr.hbm [resolvable:$true] %s509_s28 }
  0x30   : > { %v711_v10 = vld [vmem:[#allocation9 + $0x18] sm:$0xff]  ;;  %v709_v12 = vld [vmem:[#allocation9 + $0x8] sm:$0xff]  ;;  %v708_v13 = vld [vmem:[#allocation9] sm:$0xff]  ;;  %s946_s21 = sshra.s32 %s510_s28, 4  ;;  %s952_s29 = scalar_lea.hbm %s1235_s5, 16  ;;  %s947_s21 = int_to_ptr.hbm [resolvable:$true] %s946_s21 }
  0x31   : > { %367 = vmatpush.bf16.msra.mxu0 %v704_v2  ;;  %v811_v19 = vld [vmem:[%s1232_s2] ss:$0 sm:$0xff]  ;;  %s948_s16 = scalar_lea.hbm %s947_s21, 8  ;;  %p953_p10 = scmp.lt.s32.totalorder %s947_s21, %s1235_s5 }
  0x32   : > { %446 = vmatpush.bf16.msra.mxu1 %v714_v4  ;;  %481 = vmatpush.bf16.msra.mxu2 %v706_v5  ;;  %p949_p1 = scmp.ne.s32.totalorder %s947_s21, %s948_s16  ;;  %p954_p11 = scmp.lt.s32.totalorder %s952_s29, %s948_s16 }
  0x34   : > { %658 = vmatmul.msk.bf16.vlgmr.msra.gmra.mxu0 %vm356_vm0, %v339_v6  ;;  %p950_p3 = pnand %p949_p1, %p1150_p4  ;;  %p955_p12 = por %p954_p11, %p953_p10 }
  0x35   : > { %699 = vmatmul.msk.bf16.vlgmr.msra.gmra.mxu2 %vm356_vm0, %v374_v8 }
  0x36   : > { %447 = vmatpush.bf16.msra.mxu1 %v713_v7  ;;  %p951_p9 = pneg %p950_p3 }
  0x38   : > { %p956_p13 = pnand %p955_p12, %p951_p9 }
  0x3a   : > { %448 = vmatpush.bf16.msra.mxu1 %v712_v9 }
  0x3e   : > { %449 = vmatpush.bf16.msra.mxu1 %v711_v10 }
  0x42   : > { %450 = vmatpush.bf16.msra.mxu1 %v710_v11 }
  0x46   : > { %451 = vmatpush.bf16.msra.mxu1 %v709_v12 }
  0x4a   : > { %452 = vmatpush.bf16.msra.mxu1 %v708_v13 }
  0xb1   : > { %v369_v14 = vpop.f32.mrf.mxu0 }
  0xb2   : > { %v380_v15 = vpack.c.bf16 %v369_v14, %v369_v14 }
  0xb4   : > { %453 = vmatmul.bf16.vlgmr.msra.gmra.mxu1 %v380_v15 }
  0xb8   : > { %v483_v17 = vpop.f32.mrf.mxu2 }
  0xb9   : > { %v371_v16 = vpop.f32.mrf.mxu0 }
  0xc0   : > { %v485_v18 = vpop.f32.mrf.mxu2 }
 0x131   : > { %v454_v20 = vpop.f32.mrf.mxu1 }
 0x132   : > { %v484_v21 = vadd.f32 %v483_v17, %v454_v20 }
 0x134   : > { %v491_v22 = vadd.f32 %v811_v19, %v484_v21 }
 0x136   : > { %492 = vst [vmem:[%s330_s26] sm:$0xff] %v491_v22 }
 0x137   : > { %959 = shalt.err (!%p956_p13)
}
 0x138   : > { %730 = dma.vmem_to_hbm [thread:$0]  (%p1150_p4), %s508_s27, 128, %s510_s28, %s494_s6  }
 0x139   : > { %v456_v23 = vpop.f32.mrf.mxu1 }
 0x13a PF: > { %s521_s9 = sand.u32 1, %s1002_s18   ;;  %p747_p0 = pnand %p641_p6, %p1158_p7 }
 0x13b   : > { %s522_s7 = scalar_lea.sflag [#allocation5], %s521_s9 }
 0x13c   : > { %p748_p2 = pneg %p747_p0 }
 0x13e   : > { %997 = dma.done.wait (%p748_p2), %s522_s7, 128  }
 0x13f   : > { %999 = vsyncadd (%p748_p2), %s522_s7, 4294967168  ;;  %s23_s23 = sadd.s32 1, %s1022_s23   ;;  %s1243_s18 = smov %s1006_s19 }
 0x140   : > { %p20_p5 = scmp.ge.s32.totalorder %s23_s23, 4   ;;  %s1244_s19 = smov %s1010_s20 }
 0x141   : > { %s1245_s20 = smov %s1156_s11  ;;  %s1246_s21 = smov %s1018_s22 }
 0x142   : > { %s1247_s22 = smov %s1249_s30  ;;  %22 = sbr.rel (!%p20_p5) target bundleno = 8 (0x8), region = 106 }
 0x147   :  { %528 = vsyncpa [#allocation4], 1 }
 0x148   :  { %530 = vsyncpa [#allocation4 + $0x1], 1 }
 0x149   :  { %531 = vsyncpa [#allocation7], 1 }
 0x14a   :  { %532 = vsyncpa [#allocation10], 1 }
 0x14b   :  { %533 = vsyncpa [#allocation5], 1 }
 0x14c   :  { %535 = vsyncpa [#allocation5 + $0x1], 1 }

</bundles_post_ra>
